<compile_context>
chip_gen: v5e
topology: v5e:2x2
jax: 0.10.0
libtpu: 0.0.40
codegen_flags: <defaults>
</compile_context>

<pallas_src>
import functools

import jax
import jax.numpy as jnp
from jax.experimental import pallas as pl
from jax.experimental.pallas import tpu as pltpu


def _mask_tail(diff, d_total, tile_d):
    """Zero out lanes beyond the true feature dim (ragged last tile)."""
    j = pl.program_id(0)
    col = jax.lax.broadcasted_iota(jnp.int32, diff.shape, dimension=1) + j * tile_d
    return jnp.where(col < d_total, diff, 0.0)


def _sse_kernel_with_mean(mean_ref, samples_ref, partial_ref, *, d_total, tile_d):
    """Grid step j handles a (N, TILE_D) slab of the flattened tensors.

    mean_ref    : (1, TILE_D)  VMEM
    samples_ref : (N, TILE_D)  VMEM
    partial_ref : (1, 1)       SMEM  -- this tile's partial sum of squared errors
    """
    m = mean_ref[...].astype(jnp.float32)        # (1, TILE_D)
    s = samples_ref[...].astype(jnp.float32)     # (N, TILE_D)
    diff = m - s                                 # broadcast over N rows (VPU)
    if d_total % tile_d != 0:                    # static: only emitted if ragged
        diff = _mask_tail(diff, d_total, tile_d)
    partial_ref[0, 0] = jnp.sum(diff * diff)     # one reduce per tile (XLU)


def _sse_kernel_fused_mean(samples_ref, partial_ref, mean_out_ref, *, d_total, tile_d):
    """Same as above, but also computes the per-pixel mean over N in-kernel.

    samples_ref  : (N, TILE_D)  VMEM
    partial_ref  : (1, 1)       SMEM  -- per-tile partial SSE
    mean_out_ref : (1, TILE_D)  VMEM  -- per-tile mean over the N samples
    """
    s = samples_ref[...].astype(jnp.float32)     # (N, TILE_D)
    n = s.shape[0]
    m = jnp.sum(s, axis=0, keepdims=True) * (1.0 / n)   # (1, TILE_D)
    mean_out_ref[...] = m.astype(mean_out_ref.dtype)    # ragged store is clamped
    diff = m - s
    if d_total % tile_d != 0:
        diff = _mask_tail(diff, d_total, tile_d)
    partial_ref[0, 0] = jnp.sum(diff * diff)


def naive_forward(samples, mean=None, tile_d=2048):
    """Equivalent of Naive(mean, samples).forward()."""
    N, C, H, W = samples.shape
    D = C * H * W

    # --- choose a lane-dense tile width ------------------------------------
    # Never wider than the (128-rounded) feature dim; keep the double-buffered
    # (N+1, tile_d) f32 slabs within a conservative VMEM data budget.
    d128 = pl.cdiv(D, 128) * 128
    vmem_data_budget = 12 * 1024 * 1024
    budget_tile = (vmem_data_budget // (2 * (N + 1) * 4)) // 128 * 128
    tile_d = max(128, min(tile_d, d128, max(128, budget_tile)))

    num_tiles = pl.cdiv(D, tile_d)
    samples_2d = samples.reshape(N, D)

    cparams = pltpu.CompilerParams(
        dimension_semantics=("parallel",),
        vmem_limit_bytes=32 * 1024 * 1024,
    )

    if mean is None:
        # Fused path: one HBM pass computes both the per-pixel mean and the SSE.
        kern = functools.partial(_sse_kernel_fused_mean, d_total=D, tile_d=tile_d)
        partials, mean_flat = pl.pallas_call(
            kern,
            out_shape=(
                jax.ShapeDtypeStruct((num_tiles, 1), jnp.float32),
                jax.ShapeDtypeStruct((1, D), samples.dtype),
            ),
            grid_spec=pltpu.PrefetchScalarGridSpec(
                num_scalar_prefetch=0,
                grid=(num_tiles,),
                in_specs=[
                    pl.BlockSpec((N, tile_d), lambda j: (0, j)),
                ],
                out_specs=(
                    pl.BlockSpec((1, 1), lambda j: (j, 0),
                                 memory_space=pltpu.SMEM),
                    pl.BlockSpec((1, tile_d), lambda j: (0, j)),
                ),
            ),
            compiler_params=cparams,
        )(samples_2d)
        mean_nd = mean_flat.reshape(C, H, W)
    else:
        kern = functools.partial(_sse_kernel_with_mean, d_total=D, tile_d=tile_d)
        partials = pl.pallas_call(
            kern,
            out_shape=jax.ShapeDtypeStruct((num_tiles, 1), jnp.float32),
            grid_spec=pltpu.PrefetchScalarGridSpec(
                num_scalar_prefetch=0,
                grid=(num_tiles,),
                in_specs=[
                    pl.BlockSpec((1, tile_d), lambda j: (0, j)),
                    pl.BlockSpec((N, tile_d), lambda j: (0, j)),
                ],
                out_specs=pl.BlockSpec((1, 1), lambda j: (j, 0),
                                       memory_space=pltpu.SMEM),
            ),
            compiler_params=cparams,
        )(mean.reshape(1, D), samples_2d)
        mean_nd = mean

    # Tiny final reduce over one scalar per tile (masked tail contributed 0).
    mse = jnp.sum(partials) / jnp.float32(N * D)
    # PyTorch's expand() is a view: return the broadcast lazily, never
    # materialized by the kernel.
    mean_expanded = jnp.broadcast_to(mean_nd[None], (N, C, H, W))
    return mse, mean_expanded


if __name__ == "__main__":
    key = jax.random.PRNGKey(0)
    k1, k2, k3, k4 = jax.random.split(key, 4)

    # ---- aligned shapes (D = 1024) ------------------------------------------
    N, C, H, W = 2, 4, 16, 16
    samples = jax.random.normal(k1, (N, C, H, W), dtype=jnp.float32)

    # mean=None path (module computes the per-pixel mean over samples)
    mse0, mexp0 = naive_forward(samples, mean=None)
    jax.block_until_ready((mse0, mexp0))
    ref_mean0 = jnp.mean(samples, axis=0)
    ref_mexp0 = jnp.broadcast_to(ref_mean0[None], samples.shape)
    ref_mse0 = jnp.mean((ref_mexp0 - samples) ** 2)
    assert mexp0.shape == (N, C, H, W)
    assert jnp.allclose(mse0, ref_mse0, atol=1e-5, rtol=1e-5)
    assert jnp.allclose(mexp0, ref_mexp0, atol=1e-5, rtol=1e-5)

    # explicit-mean path
    mean_in = jax.random.normal(k2, (C, H, W), dtype=jnp.float32)
    mse1, mexp1 = naive_forward(samples, mean=mean_in)
    jax.block_until_ready((mse1, mexp1))
    ref_mexp1 = jnp.broadcast_to(mean_in[None], samples.shape)
    ref_mse1 = jnp.mean((ref_mexp1 - samples) ** 2)
    assert mexp1.shape == (N, C, H, W)
    assert jnp.allclose(mse1, ref_mse1, atol=1e-5, rtol=1e-5)
    assert jnp.allclose(mexp1, ref_mexp1, atol=1e-6, rtol=1e-6)

    # ---- ragged shapes (D = 105, not a multiple of 128): exercises the
    #      in-kernel tail mask (no padded copy of samples is ever made). ------
    Nr, Cr, Hr, Wr = 3, 3, 5, 7
    samples_r = jax.random.normal(k3, (Nr, Cr, Hr, Wr), dtype=jnp.float32)

    mse2, mexp2 = naive_forward(samples_r, mean=None)
    jax.block_until_ready((mse2, mexp2))
    ref_mean2 = jnp.mean(samples_r, axis=0)
    ref_mexp2 = jnp.broadcast_to(ref_mean2[None], samples_r.shape)
    ref_mse2 = jnp.mean((ref_mexp2 - samples_r) ** 2)
    assert jnp.allclose(mse2, ref_mse2, atol=1e-5, rtol=1e-5)
    assert jnp.allclose(mexp2, ref_mexp2, atol=1e-5, rtol=1e-5)

    mean_r = jax.random.normal(k4, (Cr, Hr, Wr), dtype=jnp.float32)
    mse3, mexp3 = naive_forward(samples_r, mean=mean_r)
    jax.block_until_ready((mse3, mexp3))
    ref_mexp3 = jnp.broadcast_to(mean_r[None], samples_r.shape)
    ref_mse3 = jnp.mean((ref_mexp3 - samples_r) ** 2)
    assert jnp.allclose(mse3, ref_mse3, atol=1e-5, rtol=1e-5)
    assert jnp.allclose(mexp3, ref_mexp3, atol=1e-6, rtol=1e-6)

    print("KERNEL_OK")
</pallas_src>

<mosaic_0001>
module attributes {stable_mosaic.version = 11 : i64} {
  func.func @_sse_kernel_fused_mean(%arg0: i32, %arg1: memref<2x1024xf32, #tpu.memory_space<vmem>>, %arg2: memref<1x1xf32, #tpu.memory_space<smem>>, %arg3: memref<1x1024xf32, #tpu.memory_space<vmem>>) attributes {dimension_semantics = [#tpu.dimension_semantics<parallel>], iteration_bounds = array<i64: 1>, scalar_prefetch = 0 : i64, scratch_operands = 0 : i64, tpu.core_type = #tpu.core_type<tc>, window_params = [{transform_indices = @transform_0, window_bounds = array<i64: 2, 1024>}, {transform_indices = @transform_1, window_bounds = array<i64: 1, 1>}, {transform_indices = @transform_2, window_bounds = array<i64: 1, 1024>}]} {
    %c0 = arith.constant 0 : index
    %c0_0 = arith.constant 0 : index
    %0 = vector.load %arg1[%c0, %c0_0] : memref<2x1024xf32, #tpu.memory_space<vmem>>, vector<2x1024xf32>
    %cst = arith.constant dense<0.000000e+00> : vector<1024xf32>
    %1 = vector.multi_reduction <add>, %0, %cst [0] : vector<2x1024xf32> to vector<1024xf32>
    %2 = vector.shape_cast %1 : vector<1024xf32> to vector<1x1024xf32>
    %cst_1 = arith.constant 5.000000e-01 : f32
    %3 = vector.broadcast %cst_1 : f32 to vector<1x1024xf32>
    %4 = arith.mulf %2, %3 : vector<1x1024xf32>
    %c0_2 = arith.constant 0 : index
    %c0_3 = arith.constant 0 : index
    %5 = vector.load %arg3[%c0_2, %c0_3] : memref<1x1024xf32, #tpu.memory_space<vmem>>, vector<1x1024xf32>
    tpu.vector_store %arg3[%c0_2, %c0_3], %4 {strides = array<i32>} : memref<1x1024xf32, #tpu.memory_space<vmem>>, vector<1x1024xf32>,
    %6 = vector.broadcast %4 : vector<1x1024xf32> to vector<2x1024xf32>
    %7 = arith.subf %6, %0 : vector<2x1024xf32>
    %8 = arith.mulf %7, %7 : vector<2x1024xf32>
    %9 = vector.shape_cast %8 : vector<2x1024xf32> to vector<1x2x1024xf32>
    %cst_4 = arith.constant dense<0.000000e+00> : vector<1xf32>
    %10 = vector.multi_reduction <add>, %9, %cst_4 [1, 2] : vector<1x2x1024xf32> to vector<1xf32>
    %11 = vector.shape_cast %10 : vector<1xf32> to vector<1x1x1xf32>
    %12 = vector.extract %11[0, 0, 0] : f32 from vector<1x1x1xf32>
    %c0_5 = arith.constant 0 : index
    %c0_6 = arith.constant 0 : index
    %13 = memref.load %arg2[%c0_5, %c0_6] : memref<1x1xf32, #tpu.memory_space<smem>>
    memref.store %12, %arg2[%c0_5, %c0_6] : memref<1x1xf32, #tpu.memory_space<smem>>
    return
  }
  func.func @transform_0(%arg0: i32) -> (i32, i32) {
    %c0_i32 = arith.constant 0 : i32
    %c0_i32_0 = arith.constant 0 : i32
    return %c0_i32, %arg0 : i32, i32
  }
  func.func @transform_1(%arg0: i32) -> (i32, i32) {
    %c0_i32 = arith.constant 0 : i32
    %c0_i32_0 = arith.constant 0 : i32
    return %arg0, %c0_i32 : i32, i32
  }
  func.func @transform_2(%arg0: i32) -> (i32, i32) {
    %c0_i32 = arith.constant 0 : i32
    %c0_i32_0 = arith.constant 0 : i32
    return %c0_i32, %arg0 : i32, i32
  }
}

</mosaic_0001>

<bundles_post_ra>
// kernel: tpu_custom_call.1
= control target key start
LH: loop header
LB: loop body
LE: loop exit
PB: predicated region body
PF: predicated region fallthrough
CT: control target
= control target key end

     0   :  { %8 = vsyncpa [#allocation3], 0  ;;  %s368_s0 = inlined_call_operand.hbm [shape: f32[2,1024], index: 0, kind: input, shape index: {}]   ;;  %s369_s1 = inlined_call_operand.hbm [shape: f32[1,1], index: 1, kind: output, shape index: {0}]   ;;  %s370_s2 = inlined_call_operand.hbm [shape: f32[1,1024], index: 2, kind: output, shape index: {1}]  }
   0x1   :  { %9 = vsyncpa [#allocation5], 0 }
   0x2   :  { %10 = vsyncpa [#allocation4], 0  ;;  %s16_s11 = sshll.u32 %s368_s0, 4  ;;  %s308_s12 = smov [#allocation2]   ;;  %s17_s11 = int_to_ptr.hbm [resolvable:$true] %s16_s11 }
   0x3   :  { %s18_s13 = sshll.u32 %s308_s12, 4  ;;  %s19_s13 = int_to_ptr.vmem [resolvable:$true] %s18_s13 }
   0x4   :  { %21 = dma.hbm_to_vmem [thread:$0]  %s17_s11, 256, %s19_s13, [#allocation3]  }
   0x5   :  { %302 = dma.done.wait [#allocation3], 256  }
   0x6   :  { %303 = vsyncadd [#allocation3], 4294967040  ;;  %v26_v0 = vld [vmem:[#allocation2] sm:$0xff]  ;;  %v27_v1 = vld [vmem:[#allocation2 + $0x8] sm:$0xff]  ;;  %vm49_vm0 = vcmask 1041408   ;;  %vm129_vm1 = vcmask 1040384  }
   0x7   :  { %30 = vst [vmem:[#allocation1] ss:$4 sm:$0xff] %v26_v0  ;;  %vm131_vm2 = vcmask 1042434   ;;  %vm134_vm3 = vcmask 1044484   ;;  %vm136_vm4 = vcmask 1046534   ;;  %s309_s0 = smov [#allocation7]  }
   0x8   :  { %32 = vst [vmem:[#allocation1 + $0x20] ss:$4 sm:$0xff] %v27_v1  ;;  %s219_s14 = sshll.u32 %s309_s0, 4  ;;  %s221_s17 = sshll.u32 %s370_s2, 4  ;;  %vm138_vm5 = vcmask 1045508   ;;  %vm140_vm6 = vcmask 1043456   ;;  %s220_s14 = int_to_ptr.vmem [resolvable:$true] %s219_s14  ;;  %s222_s17 = int_to_ptr.hbm [resolvable:$true] %s221_s17 }
   0x9   :  { %s210_s20 = sshll.u32 %s369_s1, 4  ;;  %s310_s21 = smov [#allocation6]   ;;  %s211_s20 = int_to_ptr.hbm [resolvable:$true] %s210_s20 }
   0xe   :  { %v33_v2 = vld.sshfl [vmem:[#allocation1] sm:$0xff pattern:$0x73625140]  ;;  %v34_v3 = vld.sshfl [vmem:[#allocation1 + $0x8] sm:$0xff pattern:$0x73625140] }
   0xf   :  { %v35_v4 = vld.sshfl [vmem:[#allocation1 + $0x10] sm:$0xff pattern:$0x73625140]  ;;  %v36_v5 = vld.sshfl [vmem:[#allocation1 + $0x18] sm:$0xff pattern:$0x73625140] }
  0x10   :  { %v37_v6 = vld.sshfl [vmem:[#allocation1 + $0x20] sm:$0xff pattern:$0x73625140]  ;;  %v38_v7 = vld.sshfl [vmem:[#allocation1 + $0x28] sm:$0xff pattern:$0x73625140] }
  0x11   :  { %v39_v8 = vld.sshfl [vmem:[#allocation1 + $0x30] sm:$0xff pattern:$0x73625140]  ;;  %v40_v9 = vld.sshfl [vmem:[#allocation1 + $0x38] sm:$0xff pattern:$0x73625140] }
  0x12   :  { %v50_v10 = vsel %vm49_vm0, %v33_v2, 0.0  ;;  %v57_v11 = vsel %vm49_vm0, %v34_v3, 0.0  ;;  %v64_v12 = vsel %vm49_vm0, %v35_v4, 0.0  ;;  %v71_v13 = vsel %vm49_vm0, %v36_v5, 0.0  ;;  %144 = vst [vmem:[#allocation1] ss:$4 sm:$0xff] %v26_v0 }
  0x13   :  { %v51_v14 = vrot.slane %v50_v10, 4  ;;  %v58_v15 = vrot.slane %v57_v11, 4  ;;  %v65_v16 = vrot.slane %v64_v12, 4  ;;  %v72_v17 = vrot.slane %v71_v13, 4  ;;  %146 = vst [vmem:[#allocation1 + $0x20] ss:$4 sm:$0xff] %v27_v1 }
  0x14   :  { %v78_v18 = vsel %vm49_vm0, %v37_v6, 0.0  ;;  %v85_v19 = vsel %vm49_vm0, %v38_v7, 0.0  ;;  %v92_v20 = vsel %vm49_vm0, %v39_v8, 0.0  ;;  %v99_v21 = vsel %vm49_vm0, %v40_v9, 0.0 }
  0x15   :  { %v52_v22 = vadd.f32 %v51_v14, %v50_v10  ;;  %v59_v23 = vadd.f32 %v58_v15, %v57_v11  ;;  %v66_v24 = vadd.f32 %v65_v16, %v64_v12  ;;  %v73_v25 = vadd.f32 %v72_v17, %v71_v13 }
  0x16   :  { %v79_v26 = vrot.slane %v78_v18, 4  ;;  %v86_v27 = vrot.slane %v85_v19, 4  ;;  %v93_v28 = vrot.slane %v92_v20, 4  ;;  %v100_v29 = vrot.slane %v99_v21, 4 }
  0x17   :  { %v53_v30 = vrot.slane %v52_v22, 2  ;;  %v60_v31 = vrot.slane %v59_v23, 2  ;;  %v67_v32 = vrot.slane %v66_v24, 2  ;;  %v74_v33 = vrot.slane %v73_v25, 2 }
  0x18   :  { %v80_v34 = vadd.f32 %v79_v26, %v78_v18  ;;  %v87_v35 = vadd.f32 %v86_v27, %v85_v19  ;;  %v94_v36 = vadd.f32 %v93_v28, %v92_v20  ;;  %v101_v37 = vadd.f32 %v100_v29, %v99_v21 }
  0x19   :  { %v54_v38 = vadd.f32 %v53_v30, %v52_v22  ;;  %v61_v39 = vadd.f32 %v60_v31, %v59_v23  ;;  %v68_v40 = vadd.f32 %v67_v32, %v66_v24  ;;  %v75_v41 = vadd.f32 %v74_v33, %v73_v25  ;;  %v147_v54 = vld.sshfl [vmem:[#allocation1] sm:$0xff pattern:$0x73625140]  ;;  %v148_v55 = vld.sshfl [vmem:[#allocation1 + $0x8] sm:$0xff pattern:$0x73625140] }
  0x1a   :  { %v81_v42 = vrot.slane %v80_v34, 2  ;;  %v88_v43 = vrot.slane %v87_v35, 2  ;;  %v95_v44 = vrot.slane %v94_v36, 2  ;;  %v102_v45 = vrot.slane %v101_v37, 2 }
  0x1b   :  { %v55_v46 = vrot.slane %v54_v38, 1  ;;  %v62_v47 = vrot.slane %v61_v39, 1  ;;  %v69_v48 = vrot.slane %v68_v40, 1  ;;  %v76_v49 = vrot.slane %v75_v41, 1 }
  0x1c   :  { %v82_v50 = vadd.f32 %v81_v42, %v80_v34  ;;  %v89_v51 = vadd.f32 %v88_v43, %v87_v35  ;;  %v96_v52 = vadd.f32 %v95_v44, %v94_v36  ;;  %v103_v53 = vadd.f32 %v102_v45, %v101_v37  ;;  %v149_v60 = vld.sshfl [vmem:[#allocation1 + $0x10] sm:$0xff pattern:$0x73625140]  ;;  %v150_v61 = vld.sshfl [vmem:[#allocation1 + $0x18] sm:$0xff pattern:$0x73625140] }
  0x1d   :  { %v56_v56 = vadd.f32 %v55_v46, %v54_v38  ;;  %v63_v57 = vadd.f32 %v62_v47, %v61_v39  ;;  %v70_v58 = vadd.f32 %v69_v48, %v68_v40  ;;  %v77_v59 = vadd.f32 %v76_v49, %v75_v41  ;;  %v151_v10 = vld.sshfl [vmem:[#allocation1 + $0x20] sm:$0xff pattern:$0x73625140]  ;;  %v152_v18 = vld.sshfl [vmem:[#allocation1 + $0x28] sm:$0xff pattern:$0x73625140] }
  0x1e   :  { %v83_v62 = vrot.slane %v82_v50, 1  ;;  %v90_v63 = vrot.slane %v89_v51, 1  ;;  %v97_v0 = vrot.slane %v96_v52, 1  ;;  %v104_v1 = vrot.slane %v103_v53, 1 }
  0x1f   :  { %v337_v2 = vmul.f32 0.5, %v56_v56  ;;  %v339_v3 = vmul.f32 0.5, %v63_v57  ;;  %v341_v4 = vmul.f32 0.5, %v70_v58  ;;  %v343_v5 = vmul.f32 0.5, %v77_v59 }
  0x20   :  { %v84_v6 = vadd.f32 %v83_v62, %v82_v50  ;;  %v91_v7 = vadd.f32 %v90_v63, %v89_v51  ;;  %v98_v8 = vadd.f32 %v97_v0, %v96_v52  ;;  %v105_v9 = vadd.f32 %v104_v1, %v103_v53  ;;  %v153_v19 = vld.sshfl [vmem:[#allocation1 + $0x30] sm:$0xff pattern:$0x73625140]  ;;  %v154_v26 = vld.sshfl [vmem:[#allocation1 + $0x38] sm:$0xff pattern:$0x73625140] }
  0x21   :  { %v163_v11 = vsub.f32 %v337_v2, %v147_v54  ;;  %v164_v12 = vsub.f32 %v339_v3, %v148_v55  ;;  %v165_v13 = vsub.f32 %v341_v4, %v149_v60  ;;  %v166_v14 = vsub.f32 %v343_v5, %v150_v61 }
  0x22   :  { %v110_v15 = vmul.f32 0.5, %v84_v6  ;;  %v111_v16 = vmul.f32 0.5, %v91_v7  ;;  %v112_v17 = vmul.f32 0.5, %v98_v8  ;;  %v113_v23 = vmul.f32 0.5, %v105_v9 }
  0x23   :  { %v171_v20 = vmul.f32 %v163_v11, %v163_v11  ;;  %v172_v21 = vmul.f32 %v164_v12, %v164_v12  ;;  %v173_v22 = vmul.f32 %v165_v13, %v165_v13  ;;  %v174_v25 = vmul.f32 %v166_v14, %v166_v14 }
  0x24   :  { %v167_v24 = vsub.f32 %v110_v15, %v151_v10  ;;  %v168_v27 = vsub.f32 %v111_v16, %v152_v18  ;;  %v169_v29 = vsub.f32 %v112_v17, %v153_v19  ;;  %v170_v34 = vsub.f32 %v113_v23, %v154_v26 }
  0x25   :  { %v179_v28 = vsel %vm49_vm0, %v171_v20, 0.0  ;;  %v180_v31 = vsel %vm49_vm0, %v172_v21, 0.0  ;;  %v182_v32 = vsel %vm49_vm0, %v173_v22, 0.0  ;;  %v184_v36 = vsel %vm49_vm0, %v174_v25, 0.0 }
  0x26   :  { %v175_v30 = vmul.f32 %v167_v24, %v167_v24  ;;  %v181_v33 = vadd.f32 %v180_v31, %v179_v28  ;;  %v176_v35 = vmul.f32 %v168_v27, %v168_v27  ;;  %v177_v38 = vmul.f32 %v169_v29, %v169_v29 }
  0x27   :  { %v178_v41 = vmul.f32 %v170_v34, %v170_v34  ;;  %v126_v56 = vrot.slane %v111_v16, 3  ;;  %v127_v57 = vrot.slane %v112_v17, 2  ;;  %v128_v58 = vrot.slane %v113_v23, 1 }
  0x28   :  { %v183_v37 = vadd.f32 %v182_v32, %v181_v33  ;;  %v186_v39 = vsel %vm49_vm0, %v175_v30, 0.0  ;;  %v188_v42 = vsel %vm49_vm0, %v176_v35, 0.0  ;;  %v190_v44 = vsel %vm49_vm0, %v177_v38, 0.0 }
  0x29   :  { %v192_v46 = vsel %vm49_vm0, %v178_v41, 0.0  ;;  %v122_v59 = vrot.slane %v339_v3, 7  ;;  %v123_v60 = vrot.slane %v341_v4, 6  ;;  %v124_v61 = vrot.slane %v343_v5, 5 }
  0x2a   :  { %v185_v40 = vadd.f32 %v184_v36, %v183_v37  ;;  %v125_v62 = vrot.slane %v110_v15, 4  ;;  %v137_v3 = vsel %vm136_vm4, %v127_v57, %v128_v58 }
  0x2b   :  { %v130_v63 = vsel %vm129_vm1, %v337_v2, %v122_v59  ;;  %v132_v0 = vsel %vm131_vm2, %v123_v60, %v124_v61 }
  0x2c   :  { %v187_v43 = vadd.f32 %v186_v39, %v185_v40  ;;  %v135_v1 = vsel %vm134_vm3, %v125_v62, %v126_v56  ;;  %v133_v4 = vsel %vm49_vm0, %v130_v63, %v132_v0 }
  0x2d   :  { %v139_v5 = vsel %vm138_vm5, %v135_v1, %v137_v3 }
  0x2e   :  { %v189_v45 = vadd.f32 %v188_v42, %v187_v43  ;;  %v141_v6 = vsel %vm140_vm6, %v133_v4, %v139_v5 }
  0x2f   :  { %143 = vst [vmem:[#allocation7] sm:$0xff] %v141_v6 }
  0x30   :  { %v191_v47 = vadd.f32 %v190_v44, %v189_v45  ;;  %224 = dma.vmem_to_hbm [thread:$0]  %s220_s14, 128, %s222_s17, [#allocation4]  }
  0x32   :  { %v193_v48 = vadd.f32 %v192_v46, %v191_v47 }
  0x34   :  { %194 = vadd.xlane.f32.xlu0 %v193_v48 }
  0xa7   :  { %v195_v49 = vpop.xlane.xlu0 %194 }
  0xa8   :  { %v196_v50 = vrot.slane %v195_v49, 4 }
  0xaa   :  { %v197_v51 = vadd.f32 %v196_v50, %v195_v49 }
  0xac   :  { %v198_v52 = vrot.slane %v197_v51, 2 }
  0xae   :  { %v199_v53 = vadd.f32 %v198_v52, %v197_v51 }
  0xb0   :  { %v200_v54 = vrot.slane %v199_v53, 1 }
  0xb2   :  { %v201_v55 = vadd.f32 %v200_v54, %v199_v53 }
  0xb4   :  { %237 = vpush %v201_v55 }
  0xe5   :  { %s238_s2 = spop %237 }
  0xe6   :  { %204 = sst [smem:[#allocation6]] %s238_s2 }
  0xe7   :  { %213 = dma.smem_to_hbm %s310_s21, 16, %s211_s20, [#allocation5]  }
  0xe8   :  { %304 = dma.done.wait [#allocation5], 16  }
  0xe9   :  { %305 = vsyncadd [#allocation5], 4294967280 }
  0xea   :  { %306 = dma.done.wait [#allocation4], 128  }
  0xeb   :  { %307 = vsyncadd [#allocation4], 4294967168 }
  0xec   :  { %233 = sfence }
  0xed   :  { %234 = vsyncpa [#allocation3], 1 }
  0xee   :  { %235 = vsyncpa [#allocation4], 1 }
  0xef   :  { %236 = vsyncpa [#allocation5], 1 }

</bundles_post_ra>
